<compile_context>
chip_gen: v5e
topology: v5e:2x2
jax: 0.10.0
libtpu: 0.0.40
codegen_flags: <defaults>
</compile_context>

<pallas_src>
import functools

import numpy as np
import jax
import jax.numpy as jnp
from jax.experimental import pallas as pl
from jax.experimental.pallas import tpu as pltpu


def _round_up(a, b):
    return (a + b - 1) // b * b


def _cdiv(a, b):
    return (a + b - 1) // b


# ----------------------------- Pallas kernel --------------------------------
def _fused_matmul_kernel(x_ref, w_ref, o_ref, *, compute_dtype):
    # x_ref: [tm, Kp] in the caller's dtype; w_ref: [Kp, Vp] in compute_dtype
    # (resident across M tiles); o_ref: [tm, Vp] in the final output dtype
    # (Vp multiple of 128 -> unmasked lane-dense stores).
    a = x_ref[...]
    if a.dtype != compute_dtype:
        # In-kernel VPU cast (e.g. f32 -> bf16) hidden under the memory
        # pipeline; avoids a separate wrapper-side HBM pass over x.
        a = a.astype(compute_dtype)
    acc = jnp.dot(a, w_ref[...], preferred_element_type=jnp.float32)
    o_ref[...] = acc.astype(o_ref.dtype)


# ------------------------ init-time weight fusion ----------------------------
def build_fused_weight(sh2s_list, shell_inverse, C):
    """Build W_full[Kp, Vp]: column v = SH2S_{shell_inverse[v]}[:C, pos(v)].

    pos(v) = position of v among the vectors of its shell (in increasing v),
    exactly the column order produced by the boolean-mask assignment in the
    PyTorch module.  Rows outside shell_inverse[v]'s C-block are zero
    (block-diagonal); padded rows (K..Kp) and padded columns (V..Vp) are zero.
    """
    S = len(sh2s_list)
    shell_inverse = np.asarray(shell_inverse)
    V = int(shell_inverse.shape[0])

    # Validation (review correctness concern): shell ids in [0, S), enough
    # SH2S rows/columns for the requested C and per-shell vector counts.
    if shell_inverse.size == 0:
        raise ValueError("shell_inverse is empty")
    if shell_inverse.min() < 0 or shell_inverse.max() >= S:
        raise ValueError("shell_inverse values must lie in [0, S)")
    counts = np.bincount(shell_inverse.astype(np.int64), minlength=S)
    for i in range(S):
        m = np.asarray(sh2s_list[i])
        if m.ndim != 2:
            raise ValueError(f"SH2S_{i} must be 2-D, got shape {m.shape}")
        if m.shape[0] < C:
            raise ValueError(f"SH2S_{i} has {m.shape[0]} rows < C={C}")
        if m.shape[1] < counts[i]:
            raise ValueError(
                f"SH2S_{i} has {m.shape[1]} columns < {counts[i]} vectors in shell {i}")

    K = S * C
    Kp = _round_up(K, 16)                 # bf16 sublane-clean contraction dim
    Vp = _round_up(max(V, 128), 128)      # lane-dense output columns
    W = np.zeros((Kp, Vp), dtype=np.float32)
    counters = [0] * S
    for v in range(V):
        s = int(shell_inverse[v])
        j = counters[s]
        counters[s] += 1
        W[s * C:(s + 1) * C, v] = np.asarray(sh2s_list[s])[:C, j]
    return W


# --------------------------------- wrapper -----------------------------------
def shell_compute_signal(x, w_full, V, *, compute_dtype=jnp.bfloat16,
                         out_dtype=None):
    """x: [B, Cin, S, C];  w_full: [Kp, Vp] from build_fused_weight.

    Returns y: [B, Cin, V].  MXU inputs are `compute_dtype` (bf16 by default,
    f32 available for stricter parity with the f32 module), accumulation is
    f32, and the kernel stores directly in `out_dtype` (default: x.dtype).
    """
    B, Cin, S, C = x.shape
    M = B * Cin
    K = S * C
    compute_dtype = np.dtype(compute_dtype)
    out_dtype = np.dtype(x.dtype if out_dtype is None else out_dtype)

    w = jnp.asarray(w_full).astype(compute_dtype)   # tiny; one-time per call
    Kp, Vp = w.shape
    assert Kp >= K and Kp % 8 == 0 and Vp % 128 == 0 and Vp >= V

    # Contiguous reshape — no HBM transpose of x; fed in its native dtype
    # (any bf16 cast happens inside the kernel).
    x_flat = x.reshape(M, K)
    if Kp != K:
        # Zero rows of W beyond K make the padded values irrelevant.
        x_flat = jnp.pad(x_flat, ((0, 0), (0, Kp - K)))
    Mp = _round_up(M, 8)                 # pad only to sublane granularity
    if Mp != M:
        x_flat = jnp.pad(x_flat, ((0, Mp - M), (0, 0)))

    xbytes = x_flat.dtype.itemsize
    wbytes = compute_dtype.itemsize
    obytes = out_dtype.itemsize

    # ---- M-tile selection (review: raise the cap, budget VMEM per gen) -----
    VMEM_BUDGET = 40 << 20               # conservative vs v7x's 64 MiB physical
    TM_MAX = 2048                        # review-suggested sweep range 1024-2048
    per_row = 2 * Kp * xbytes + 2 * Vp * obytes      # dbl-buffered x + out rows
    resident = 2 * Kp * Vp * wbytes                  # W (default dbl-buffered)
    # TODO(synk): pipeline_mode=pl.Buffered(1) on the resident-W BlockSpec would
    # reclaim its never-refetched second buffer (Kp*Vp*wbytes) on v7x; omitted
    # here (negligible vs budget) pending verification on this JAX version.
    tm_cap = max(8, min(TM_MAX, ((VMEM_BUDGET - resident) // max(per_row, 1)) // 8 * 8))
    num_steps = max(1, _cdiv(Mp, tm_cap))
    if num_steps == 1 and Mp >= 256:
        num_steps = 2                    # v7x: keep >=2 parallel steps (2 TCs)
    tm = min(tm_cap, _round_up(_cdiv(Mp, num_steps), 8))
    grid = _cdiv(Mp, tm)                 # ragged last block handled by pipeline

    vmem_need = 2 * tm * Kp * xbytes + 2 * tm * Vp * obytes + resident
    vmem_limit = int(min(max(int(1.25 * vmem_need) + (1 << 20), 16 << 20), 48 << 20))

    cost = pl.CostEstimate(
        flops=2 * Mp * Kp * Vp,
        transcendentals=0,
        bytes_accessed=Mp * Kp * xbytes + Kp * Vp * wbytes + Mp * Vp * obytes,
    )

    kernel = functools.partial(_fused_matmul_kernel, compute_dtype=compute_dtype)

    out = pl.pallas_call(
        kernel,
        out_shape=jax.ShapeDtypeStruct((Mp, Vp), out_dtype),
        grid_spec=pltpu.PrefetchScalarGridSpec(
            num_scalar_prefetch=0,
            grid=(grid,),
            in_specs=[
                pl.BlockSpec((tm, Kp), lambda i: (i, 0)),
                pl.BlockSpec((Kp, Vp), lambda i: (0, 0)),   # weight resident
            ],
            out_specs=pl.BlockSpec((tm, Vp), lambda i: (i, 0)),
        ),
        compiler_params=pltpu.CompilerParams(
            dimension_semantics=("parallel",),
            vmem_limit_bytes=vmem_limit,
        ),
        cost_estimate=cost,
    )(x_flat, w)                                   # [Mp, Vp] in out_dtype

    return out[:M, :V].reshape(B, Cin, V)


# ----------------------------------- main ------------------------------------
if __name__ == "__main__":
    key = jax.random.PRNGKey(0)
    k_x, k_w0, k_w1, k_perm = jax.random.split(key, 4)

    # Small, module-consistent shapes.
    B, Cin = 2, 4          # batch, in_channels
    S = 2                  # number of shells
    C = 8                  # SH coefficients actually used (x.shape[3])
    C_full = 16            # rows stored in each SH2S buffer (>= C)
    V_per_shell = [12, 20] # vectors per shell
    V = sum(V_per_shell)

    # Deterministic SH2S buffers (module __init__ registers one per shell).
    sh2s_list = [
        np.asarray(jax.random.normal(k_w0, (C_full, V_per_shell[0]), jnp.float32)),
        np.asarray(jax.random.normal(k_w1, (C_full, V_per_shell[1]), jnp.float32)),
    ]

    # Non-contiguous shell_inverse (deterministic permutation of shell ids).
    shell_ids = np.concatenate(
        [np.full(v, i, dtype=np.int32) for i, v in enumerate(V_per_shell)]
    )
    perm = np.asarray(jax.random.permutation(k_perm, V))
    shell_inverse = shell_ids[perm]

    # Input.
    x = jax.random.normal(k_x, (B, Cin, S, C), jnp.float32)
    x_np = np.asarray(x)

    # Init-time (module __init__ analogue): fuse weights + scatter into one W.
    w_full = build_fused_weight(sh2s_list, shell_inverse, C)

    # f32 reference with exact module semantics.
    y_ref32 = np.zeros((B, Cin, V), dtype=np.float32)
    for i in range(S):
        mask = shell_inverse == i
        y_ref32[:, :, mask] = x_np[:, :, i] @ sh2s_list[i][:C]

    # 1) Default path: bf16 MXU inputs, f32 accumulation, output in x.dtype.
    y = shell_compute_signal(x, w_full, V)
    y = jax.block_until_ready(y)
    assert y.shape == (B, Cin, V) and y.dtype == x.dtype

    # bf16-quantized reference (exactly the kernel's input rounding) — tight.
    def _bf16(a):
        return np.asarray(jnp.asarray(a).astype(jnp.bfloat16).astype(jnp.float32))

    xq = _bf16(x_np)
    y_refq = np.zeros((B, Cin, V), dtype=np.float32)
    for i in range(S):
        mask = shell_inverse == i
        y_refq[:, :, mask] = xq[:, :, i] @ _bf16(sh2s_list[i][:C])
    np.testing.assert_allclose(np.asarray(y), y_refq, rtol=1e-3, atol=1e-3)
    # ...and against the true f32 module output (bounded by bf16 input rounding).
    np.testing.assert_allclose(np.asarray(y), y_ref32, rtol=5e-2, atol=2.5e-1)

    # 2) f32 compute path (closer parity with the f32 PyTorch module).
    y32 = shell_compute_signal(x, w_full, V, compute_dtype=jnp.float32)
    y32 = jax.block_until_ready(y32)
    assert y32.dtype == jnp.float32
    np.testing.assert_allclose(np.asarray(y32), y_ref32, rtol=5e-2, atol=2.5e-1)

    # 3) bf16 output path (review: final-dtype store halves HBM writeback).
    ybf = shell_compute_signal(x, w_full, V, out_dtype=jnp.bfloat16)
    ybf = jax.block_until_ready(ybf)
    assert ybf.dtype == jnp.bfloat16
    np.testing.assert_allclose(np.asarray(ybf, dtype=np.float32), y_refq,
                               rtol=1e-2, atol=5e-2)

    print("KERNEL_OK")
</pallas_src>

<mosaic_0001>
module attributes {stable_mosaic.version = 11 : i64} {
  func.func @_fused_matmul_kernel(%arg0: i32, %arg1: memref<8x16xf32, #tpu.memory_space<vmem>>, %arg2: memref<16x128xbf16, #tpu.memory_space<vmem>>, %arg3: memref<8x128xf32, #tpu.memory_space<vmem>>) attributes {dimension_semantics = [#tpu.dimension_semantics<parallel>], iteration_bounds = array<i64: 1>, scalar_prefetch = 0 : i64, scratch_operands = 0 : i64, tpu.core_type = #tpu.core_type<tc>, window_params = [{transform_indices = @transform_0, window_bounds = array<i64: 8, 16>}, {pipeline_mode = #tpu.pipeline_mode<synchronous>, transform_indices = @transform_1, window_bounds = array<i64: 16, 128>}, {transform_indices = @transform_2, window_bounds = array<i64: 8, 128>}]} {
    %c0 = arith.constant 0 : index
    %c0_0 = arith.constant 0 : index
    %0 = vector.load %arg1[%c0, %c0_0] : memref<8x16xf32, #tpu.memory_space<vmem>>, vector<8x16xf32>
    %1 = arith.truncf %0 : vector<8x16xf32> to vector<8x16xbf16>
    %c0_1 = arith.constant 0 : index
    %c0_2 = arith.constant 0 : index
    %2 = vector.load %arg2[%c0_1, %c0_2] : memref<16x128xbf16, #tpu.memory_space<vmem>>, vector<16x128xbf16>
    %cst = arith.constant dense<0.000000e+00> : vector<8x128xf32>
    %3 = tpu.matmul %1, %2, %cst {dimension_numbers = #tpu.dot_dimension_numbers<[1], [0], [0], [1], [0, 0, 1, 1], [], []>} : vector<8x16xbf16>, vector<16x128xbf16>, vector<8x128xf32> -> vector<8x128xf32>
    %c0_3 = arith.constant 0 : index
    %c0_4 = arith.constant 0 : index
    %4 = vector.load %arg3[%c0_3, %c0_4] : memref<8x128xf32, #tpu.memory_space<vmem>>, vector<8x128xf32>
    tpu.vector_store %arg3[%c0_3, %c0_4], %3 {strides = array<i32>} : memref<8x128xf32, #tpu.memory_space<vmem>>, vector<8x128xf32>,
    return
  }
  func.func @transform_0(%arg0: i32) -> (i32, i32) {
    %c0_i32 = arith.constant 0 : i32
    %c0_i32_0 = arith.constant 0 : i32
    return %arg0, %c0_i32 : i32, i32
  }
  func.func @transform_1(%arg0: i32) -> (i32, i32) {
    %c0_i32 = arith.constant 0 : i32
    %c0_i32_0 = arith.constant 0 : i32
    %c0_i32_1 = arith.constant 0 : i32
    return %c0_i32, %c0_i32_0 : i32, i32
  }
  func.func @transform_2(%arg0: i32) -> (i32, i32) {
    %c0_i32 = arith.constant 0 : i32
    %c0_i32_0 = arith.constant 0 : i32
    return %arg0, %c0_i32 : i32, i32
  }
}

</mosaic_0001>

<bundles_post_ra>
// kernel: tpu_custom_call.1
= control target key start
LH: loop header
LB: loop body
LE: loop exit
PB: predicated region body
PF: predicated region fallthrough
CT: control target
= control target key end

     0   :  { %7 = vsyncpa [#allocation3], 0  ;;  %s207_s0 = inlined_call_operand.hbm [shape: f32[8,16], index: 0, kind: input, shape index: {}]   ;;  %s208_s1 = inlined_call_operand.hbm [shape: bf16[16,128], index: 1, kind: input, shape index: {}]   ;;  %s209_s2 = inlined_call_operand.hbm [shape: f32[8,128], index: 2, kind: output, shape index: {}]  }
   0x1   :  { %8 = vsyncpa [#allocation6], 0 }
   0x2   :  { %9 = vsyncpa [#allocation4], 0  ;;  %s15_s11 = sshll.u32 %s207_s0, 4  ;;  %s178_s12 = smov [#allocation2]   ;;  %s16_s11 = int_to_ptr.hbm [resolvable:$true] %s15_s11 }
   0x3   :  { %s17_s13 = sshll.u32 %s178_s12, 4  ;;  %s25_s16 = sshll.u32 %s208_s1, 4  ;;  %s18_s13 = int_to_ptr.vmem [resolvable:$true] %s17_s13  ;;  %s26_s16 = int_to_ptr.hbm [resolvable:$true] %s25_s16 }
   0x4   :  { %20 = dma.hbm_to_vmem [thread:$0]  %s16_s11, 128, %s18_s13, [#allocation3]  }
   0x5   :  { %s179_s17 = smov [#allocation5]   ;;  %s180_s19 = smov 64  }
   0x6   :  { %s27_s18 = sshll.u32 %s179_s17, 4  ;;  %s181_s20 = smov 4   ;;  %s28_s18 = int_to_ptr.vmem [resolvable:$true] %s27_s18 }
   0x7   :  { %33 = dma.hbm_to_vmem [thread:$0]  %s26_s16, 128, %s28_s18, [#allocation6], %s180_s19, %s180_s19, %s181_s20  }
   0x8   :  { %172 = dma.done.wait [#allocation3], 128  }
   0x9   :  { %173 = vsyncadd [#allocation3], 4294967168 }
   0xa   :  { %174 = dma.done.wait [#allocation6], 128  }
   0xb   :  { %175 = vsyncadd [#allocation6], 4294967168  ;;  %v94_v0 = vld [vmem:[#allocation5] sm:$0xff]  ;;  %v43_v1 = vld [vmem:[#allocation2] sm:$0xff]  ;;  %vm53_vm0 = vcmask 130048   ;;  %s182_s0 = smov [#allocation7]  }
   0xc   :  { %v44_v2 = vpack.c.bf16 %v43_v1, %v43_v1  ;;  %64 = vmatpush.bf16.msra.mxu0 %v94_v0  ;;  %s76_s1 = sshll.u32 %s182_s0, 4  ;;  %s78_s23 = sshll.u32 %s209_s2, 4  ;;  %s77_s1 = int_to_ptr.vmem [resolvable:$true] %s76_s1  ;;  %s79_s23 = int_to_ptr.hbm [resolvable:$true] %s78_s23 }
   0xf   :  { %93 = vmatmul.msk.bf16.vlgmr.msra.gmra.mxu0 %vm53_vm0, %v44_v2 }
  0x8c   :  { %v66_v3 = vpop.f32.mrf.mxu0 }
  0x8d   :  { %70 = vst [vmem:[#allocation7] sm:$0xff] %v66_v3 }
  0x8e   :  { %81 = dma.vmem_to_hbm [thread:$0]  %s77_s1, 128, %s79_s23, [#allocation4]  }
  0x94   :  { %v68_v4 = vpop.f32.mrf.mxu0 }
  0x95   :  { %176 = dma.done.wait [#allocation4], 128  }
  0x96   :  { %177 = vsyncadd [#allocation4], 4294967168 }
  0x97   :  { %86 = vsyncpa [#allocation3], 1 }
  0x98   :  { %87 = vsyncpa [#allocation6], 1 }
  0x99   :  { %88 = vsyncpa [#allocation4], 1 }

</bundles_post_ra>
